<compile_context>
chip_gen: v6e
topology: v6e:2x2x1
jax: 0.10.0
libtpu: 0.0.40
codegen_flags: <defaults>
</compile_context>

<pallas_src>
import jax
import jax.numpy as jnp
from jax.experimental import pallas as pl
from jax.experimental.pallas import tpu as pltpu


def _hbm_copy_kernel(emb_hbm_ref, out_hbm_ref, sem):
    # Abstract base class: no math is defined.  The invariant is that the
    # embeddings reach the (subclass) decoder untouched, so the kernel is a
    # single whole-array HBM->HBM DMA (no VMEM staging, no vector core work).
    cp = pltpu.make_async_copy(emb_hbm_ref, out_hbm_ref, sem)
    cp.start()
    cp.wait()


def text_base_decoder_forward(
    embeddings: jax.Array, *, reuse_input: bool = False
) -> jax.Array:
    """Pallas pass-through of TextBaseDecoder.forward's embedding input.

    embeddings: (B, S, H) float32/bfloat16
    returns:    same shape/dtype, identical values.

    reuse_input=True: the caller accepts the same buffer back (e.g. the
    embeddings are a dead upstream intermediate or a donated buffer).  In that
    case an identity needs zero HBM traffic, so no kernel is launched at all.
    reuse_input=False: the caller requires a distinct output buffer; a single
    DMA-engine HBM->HBM copy materializes it.
    """
    if reuse_input:
        # Zero-traffic fast path: identity, same buffer back.
        return embeddings

    nbytes = embeddings.size * embeddings.dtype.itemsize

    return pl.pallas_call(
        _hbm_copy_kernel,
        out_shape=jax.ShapeDtypeStruct(embeddings.shape, embeddings.dtype),
        in_specs=[pl.BlockSpec(memory_space=pl.ANY)],
        out_specs=pl.BlockSpec(memory_space=pl.ANY),
        scratch_shapes=[pltpu.SemaphoreType.DMA],
        cost_estimate=pl.CostEstimate(
            flops=0, transcendentals=0, bytes_accessed=2 * nbytes
        ),
    )(embeddings)


if __name__ == "__main__":
    key = jax.random.PRNGKey(0)
    # Small shapes consistent with a text decoder input: batch=2, seq=8, hidden=32.
    B, S, H = 2, 8, 32
    embeddings = jax.random.normal(key, (B, S, H), dtype=jnp.float32)

    # Path A: caller needs a fresh buffer -> one HBM->HBM DMA copy.
    out = jax.block_until_ready(text_base_decoder_forward(embeddings))
    assert out.shape == (B, S, H)
    assert out.dtype == embeddings.dtype
    assert bool(jnp.allclose(out, embeddings))

    # Path B: typical fused usage -- the embeddings are an upstream
    # intermediate whose buffer the caller is happy to receive back, so the
    # decoder boundary costs nothing (no kernel launch, no HBM traffic).
    @jax.jit
    def fused(emb):
        upstream = emb * 2.0  # stand-in for a real upstream encoder output
        return text_base_decoder_forward(upstream, reuse_input=True)

    out2 = jax.block_until_ready(fused(embeddings))
    assert out2.shape == (B, S, H)
    assert bool(jnp.allclose(out2, embeddings * 2.0))

    print("KERNEL_OK")
</pallas_src>

<mosaic_0001>
module attributes {stable_mosaic.version = 11 : i64} {
  func.func @_hbm_copy_kernel(%arg0: memref<2x8x32xf32, #tpu.memory_space<any>>, %arg1: memref<2x8x32xf32, #tpu.memory_space<any>>, %arg2: memref<!tpu.dma_semaphore, #tpu.memory_space<semaphore_mem>>) attributes {dimension_semantics = [], scalar_prefetch = 0 : i64, scratch_operands = 1 : i64, tpu.core_type = #tpu.core_type<tc>} {
    tpu.enqueue_dma source(%arg0 : memref<2x8x32xf32, #tpu.memory_space<any>>) target(%arg1 : memref<2x8x32xf32, #tpu.memory_space<any>>) target_semaphore(%arg2 : memref<!tpu.dma_semaphore, #tpu.memory_space<semaphore_mem>>)
    tpu.wait_dma2 semaphore(%arg2 : memref<!tpu.dma_semaphore, #tpu.memory_space<semaphore_mem>>) src(%arg0 : memref<2x8x32xf32, #tpu.memory_space<any>>) dst(%arg1 : memref<2x8x32xf32, #tpu.memory_space<any>>)
    return
  }
}

</mosaic_0001>

<bundles_post_ra>
// kernel: tpu_custom_call.1
= control target key start
LH: loop header
LB: loop body
LE: loop exit
PB: predicated region body
PF: predicated region fallthrough
CT: control target
= control target key end

     0   :  { %s29_s6 = smov [#allocation2]   ;;  %s30_s7 = smov 131072   ;;  %s48_s0 = inlined_call_operand.hbm [shape: f32[2,8,32], index: 0, kind: input, shape index: {}]   ;;  %s49_s1 = inlined_call_operand.hbm [shape: f32[2,8,32], index: 1, kind: output, shape index: {}]  }
   0x1   :  { %s31_s8 = smov 0  }
   0x2   :  { %12 = dma.general %s48_s0, 256, %s49_s1, %s29_s6, %s30_s7, [#allocation4], %s31_s8, 0  }
   0x3   :  { %27 = dma.done.wait [#allocation2], 256 }
   0x4   :  { %28 = vsyncadd [#allocation2], 4294967040 }
   0x5   :  { %17 = vsyncmov [#allocation2] }
   0x8   :  { %s18_s13 = vpop.sfrf %17 }
   0x9   :  { %p23_p0 = scmp.ne.s32.totalorder %s18_s13, 0 }
   0xb   :  { %22 = shalt.err (%p23_p0)  }

</bundles_post_ra>
